<compile_context>
chip_gen: v7x
topology: tpu7x:2x2x1
jax: 0.10.0
libtpu: 0.0.40
codegen_flags: <defaults>
</compile_context>

<pallas_src>
import functools

import jax
import jax.numpy as jnp
from jax import lax
from jax.experimental import pallas as pl
from jax.experimental.pallas import tpu as pltpu

EPS = 1e-5
LANE = 128
SUBLANE = 8
H_CHUNK_DEFAULT = 512          # max hidden columns processed per inner grid step


def _round_up(v, m):
    return (v + m - 1) // m * m


def _pick_h_chunk(h_p, h_chunk):
    """Largest multiple of LANE <= h_chunk that divides h_p (h_p % 128 == 0)."""
    if h_p <= h_chunk:
        return h_p, 1
    hc = max(LANE, (h_chunk // LANE) * LANE)
    while h_p % hc:
        hc -= LANE
    return hc, h_p // hc


def _vmem_limit_bytes(n_pad, in_p, p_p, hc, out_p, chunked):
    f32, bf16 = 4, 2
    # Resident scratch: f32 + bf16 activation (+ f32 fc2 accumulator if chunked).
    b = n_pad * p_p * (f32 + bf16) + (n_pad * p_p * f32 if chunked else 0)
    # Streamed per-step blocks (double-buffered by the BlockSpec pipeline).
    b += 2 * (2 * p_p * hc * bf16 + 2 * hc * f32 + 2 * p_p * f32)
    # Constant blocks (x / stem / head params / output); also double-buffered.
    b += 2 * (n_pad * in_p * bf16 + in_p * p_p * bf16 + 2 * p_p * f32
              + p_p * out_p * bf16 + out_p * f32 + n_pad * out_p * f32)
    # Live f32 intermediates (per-chunk h1, BN temporaries, casts) + headroom.
    b += 4 * n_pad * max(hc, p_p) * f32
    return int(min(100 << 20, max(32 << 20, int(b * 1.25) + (2 << 20))))


# ---------------------------------------------------------------------------
# Fused kernel: grid = (layer, hidden-chunk)
#   stem at (0,0), one fc1/bn1/relu/fc2 hidden-chunk per step, bn2+residual+
#   relu at the last chunk, fc_out at the very last step.
# ---------------------------------------------------------------------------
def _make_fused_kernel(n, n_pad, p_p, n_hc, two_pass_bn):
    use_mask = n != n_pad
    inv_n = 1.0 / n
    single_chunk = n_hc == 1

    def _bn(y, gb_ref, rmask):
        """BatchNorm1d with batch statistics; gb_ref rows = [gamma; beta]."""
        g = gb_ref[0:1, :]
        b = gb_ref[1:2, :]
        ym = y if rmask is None else y * rmask
        mean = jnp.sum(ym, axis=0, keepdims=True) * inv_n
        if two_pass_bn:
            # Robust variance from (y - mean); one extra VPU op per element.
            d = y - mean
            dm = d if rmask is None else d * rmask
            var = jnp.sum(dm * dm, axis=0, keepdims=True) * inv_n
            scale = lax.rsqrt(var + EPS) * g
            return d * scale + b
        # Fast single-pass form: 2-op normalize (y*scale + shift).
        s2 = jnp.sum(ym * y, axis=0, keepdims=True)
        var = jnp.maximum(s2 * inv_n - mean * mean, 0.0)
        scale = lax.rsqrt(var + EPS) * g
        return y * scale + (b - mean * scale)

    def kernel(x_ref, ws_ref, gbs_ref, w1_ref, gb1_ref, w2_ref, gb2_ref,
               wo_ref, bo_ref, o_ref, h_ref, xb_ref, *maybe_acc):
        acc_ref = maybe_acc[0] if maybe_acc else None
        l = pl.program_id(0)
        c = pl.program_id(1)
        last_l = pl.num_programs(0) - 1
        last_c = pl.num_programs(1) - 1

        if use_mask:
            rmask = (lax.broadcasted_iota(jnp.int32, (n_pad, 1), 0) < n
                     ).astype(jnp.float32)
        else:
            rmask = None
        # Stem / BN1 inputs have zero padded rows (biases dropped, activation
        # pad rows zeroed), so single-pass sums need no mask there; only the
        # two-pass path (which subtracts the mean first) does.  BN2's input
        # always has non-zero padded rows -> masked sums.
        pre_mask = rmask if two_pass_bn else None

        def commit(h_f32):
            """Store activation (f32 + bf16 copy); zero padded batch rows."""
            h_ref[...] = h_f32
            if use_mask:
                zrow = jnp.zeros((1, p_p), jnp.float32)
                for r in range(n, n_pad):          # <= 7 tiny row stores
                    h_ref[r:r + 1, :] = zrow
                xb_ref[...] = h_ref[...].astype(jnp.bfloat16)
            else:
                xb_ref[...] = h_f32.astype(jnp.bfloat16)

        # ---- stem: fc1 -> bn1 -> relu, once at the very first grid step ----
        @pl.when(jnp.logical_and(l == 0, c == 0))
        def _stem():
            y = jnp.dot(x_ref[...], ws_ref[...],
                        preferred_element_type=jnp.float32)
            commit(jnp.maximum(_bn(y, gbs_ref, pre_mask), 0.0))

        # ---- one hidden chunk of the current Block --------------------------
        h1 = jnp.dot(xb_ref[...], w1_ref[...],
                     preferred_element_type=jnp.float32)
        h1 = jnp.maximum(_bn(h1, gb1_ref, pre_mask), 0.0)
        part = jnp.dot(h1.astype(jnp.bfloat16), w2_ref[...],
                       preferred_element_type=jnp.float32)
        if single_chunk:
            y2_full = part                       # no accumulator round-trip
        else:
            @pl.when(c == 0)
            def _init_acc():
                acc_ref[...] = jnp.zeros_like(acc_ref)
            acc_ref[...] += part

        # ---- finish the Block: bn2 + residual + relu ------------------------
        @pl.when(c == last_c)
        def _finish():
            identity = h_ref[...]                # block input, pad rows zero
            y2 = y2_full if single_chunk else acc_ref[...]
            out = jnp.maximum(_bn(y2, gb2_ref, rmask) + identity, 0.0)
            commit(out)

        # ---- output head: fc_out --------------------------------------------
        @pl.when(jnp.logical_and(l == last_l, c == last_c))
        def _head():
            o = jnp.dot(xb_ref[...], wo_ref[...],
                        preferred_element_type=jnp.float32)
            o_ref[...] = o + bo_ref[...]

    return kernel


# ---------------------------------------------------------------------------
# Forward wrapper: one pallas_call for the whole network
# ---------------------------------------------------------------------------
def residual_network_forward(packed, x, *, output_size, two_pass_bn=False,
                             h_chunk=H_CHUNK_DEFAULT):
    n, f_in = x.shape
    assert n > 0, "batch must be non-empty (BatchNorm batch statistics)"
    in_p, p_p = packed["w_stem"].shape
    n_layers, _, h_p = packed["w1"].shape            # 4 * num_blocks layers
    out_p = packed["w_out"].shape[1]
    n_pad = max(SUBLANE, _round_up(n, SUBLANE))
    hc, n_hc = _pick_h_chunk(h_p, h_chunk)

    # Pad batch to a sublane multiple; build in bf16 (kernel matmul dtype).
    x_pad = jnp.zeros((n_pad, in_p), jnp.bfloat16).at[:n, :f_in].set(
        x.astype(jnp.bfloat16))

    kernel = _make_fused_kernel(n, n_pad, p_p, n_hc, two_pass_bn)

    scratch = [pltpu.VMEM((n_pad, p_p), jnp.float32),    # activation (f32)
               pltpu.VMEM((n_pad, p_p), jnp.bfloat16)]   # activation (bf16 copy)
    if n_hc > 1:
        scratch.append(pltpu.VMEM((n_pad, p_p), jnp.float32))   # fc2 accumulator

    grid_spec = pltpu.PrefetchScalarGridSpec(
        num_scalar_prefetch=0,
        grid=(n_layers, n_hc),
        in_specs=[
            pl.BlockSpec((n_pad, in_p), lambda l, c: (0, 0)),               # x
            pl.BlockSpec((in_p, p_p), lambda l, c: (0, 0)),                 # stem W
            pl.BlockSpec((2, p_p), lambda l, c: (0, 0)),                    # stem [g;b]
            pl.BlockSpec((pl.Squeezed(), p_p, hc), lambda l, c: (l, 0, c)),  # W1 tile
            pl.BlockSpec((pl.Squeezed(), 2, hc), lambda l, c: (l, 0, c)),    # bn1 tile
            pl.BlockSpec((pl.Squeezed(), hc, p_p), lambda l, c: (l, c, 0)),  # W2 tile
            pl.BlockSpec((pl.Squeezed(), 2, p_p), lambda l, c: (l, 0, 0)),   # bn2
            pl.BlockSpec((p_p, out_p), lambda l, c: (0, 0)),                # out W
            pl.BlockSpec((1, out_p), lambda l, c: (0, 0)),                  # out bias
        ],
        out_specs=pl.BlockSpec((n_pad, out_p), lambda l, c: (0, 0)),
        scratch_shapes=scratch,
    )

    vmem_limit = _vmem_limit_bytes(n_pad, in_p, p_p, hc, out_p, n_hc > 1)

    y_pad = pl.pallas_call(
        kernel,
        out_shape=jax.ShapeDtypeStruct((n_pad, out_p), jnp.float32),
        grid_spec=grid_spec,
        compiler_params=pltpu.CompilerParams(
            dimension_semantics=("arbitrary", "arbitrary"),   # sequential loops
            vmem_limit_bytes=vmem_limit),
    )(x_pad,
      packed["w_stem"], packed["gb_stem"],
      packed["w1"], packed["gb1"], packed["w2"], packed["gb2"],
      packed["w_out"], packed["b_out"])

    return y_pad[:n, :output_size]


# ---------------------------------------------------------------------------
# Parameter construction (mimics the module's init scheme)
# ---------------------------------------------------------------------------
def make_params(key, input_size, output_size, inplanes, hidden_size,
                output_bias, num_blocks, *, randomize_bn=False):
    n_layers = 4 * num_blocks
    keys = iter(jax.random.split(key, 8 * n_layers + 16))

    def linear(fan_in, fan_out):
        # kaiming_normal_(mode='fan_out', nonlinearity='relu'); stored [in,out]
        kw, kb = jax.random.split(next(keys))
        w = (2.0 / fan_out) ** 0.5 * jax.random.normal(
            kw, (fan_in, fan_out), jnp.float32)
        bound = 1.0 / (fan_in ** 0.5)
        b = jax.random.uniform(kb, (1, fan_out), jnp.float32, -bound, bound)
        return w, b

    def bn(f, zero_gamma=False):
        if randomize_bn:   # exercise the full Block path in tests
            g = 1.0 + 0.5 * jax.random.normal(next(keys), (1, f), jnp.float32)
            be = 0.1 * jax.random.normal(next(keys), (1, f), jnp.float32)
        else:              # faithful to the module init
            g = jnp.zeros((1, f), jnp.float32) if zero_gamma else \
                jnp.ones((1, f), jnp.float32)
            be = jnp.zeros((1, f), jnp.float32)
        return g, be

    params = {}
    w, b = linear(input_size, inplanes)
    g, be = bn(inplanes)
    params["stem"] = dict(w=w, b=b, g=g, be=be)

    blocks = []
    for _ in range(n_layers):
        w1, b1 = linear(inplanes, hidden_size)
        g1, be1 = bn(hidden_size)
        w2, b2 = linear(hidden_size, inplanes)
        g2, be2 = bn(inplanes, zero_gamma=True)   # Block.bn2.weight zero-init
        blocks.append(dict(w1=w1, b1=b1, g1=g1, be1=be1,
                           w2=w2, b2=b2, g2=g2, be2=be2))
    params["blocks"] = blocks

    w, b = linear(inplanes, output_size)
    if not output_bias:
        b = jnp.zeros_like(b)
    params["out"] = dict(w=w, b=b)
    return params


def pack_params(params):
    """Pad features to 128 lanes, stack per-layer params, cast weights to bf16.

    BN (gamma, beta) pairs are packed into one (2, F) slab per BN so each grid
    step issues one parameter DMA per BN instead of two.  Pre-BN linear biases
    are dropped (cancelled exactly by BN's mean subtraction).
    """
    def pad2(a, r, c):
        return jnp.pad(a, ((0, r - a.shape[0]), (0, c - a.shape[1])))

    def gb(g, be, f_pad):
        return jnp.concatenate([pad2(g, 1, f_pad), pad2(be, 1, f_pad)], axis=0)

    in_f, planes = params["stem"]["w"].shape
    hidden = params["blocks"][0]["w1"].shape[1]
    out_f = params["out"]["w"].shape[1]
    in_p, p_p, h_p, out_p = (_round_up(d, LANE)
                             for d in (in_f, planes, hidden, out_f))
    blks = params["blocks"]
    return {
        "w_stem": pad2(params["stem"]["w"], in_p, p_p).astype(jnp.bfloat16),
        "gb_stem": gb(params["stem"]["g"], params["stem"]["be"], p_p),
        "w1": jnp.stack([pad2(b["w1"], p_p, h_p) for b in blks]
                        ).astype(jnp.bfloat16),
        "gb1": jnp.stack([gb(b["g1"], b["be1"], h_p) for b in blks]),
        "w2": jnp.stack([pad2(b["w2"], h_p, p_p) for b in blks]
                        ).astype(jnp.bfloat16),
        "gb2": jnp.stack([gb(b["g2"], b["be2"], p_p) for b in blks]),
        "w_out": pad2(params["out"]["w"], p_p, out_p).astype(jnp.bfloat16),
        "b_out": pad2(params["out"]["b"], 1, out_p),
    }


# ---------------------------------------------------------------------------
# Pure-JAX reference (PyTorch semantics incl. pre-BN biases; bf16 matmuls)
# ---------------------------------------------------------------------------
def _bn_ref(y, g, be):
    m = jnp.mean(y, axis=0, keepdims=True)
    v = jnp.mean((y - m) ** 2, axis=0, keepdims=True)
    return (y - m) / jnp.sqrt(v + EPS) * g + be


def _mm(a, w):
    return jnp.dot(a.astype(jnp.bfloat16), w.astype(jnp.bfloat16),
                   preferred_element_type=jnp.float32)


def reference_forward(params, x):
    s = params["stem"]
    h = jax.nn.relu(_bn_ref(_mm(x, s["w"]) + s["b"], s["g"], s["be"]))
    for p in params["blocks"]:
        t = jax.nn.relu(_bn_ref(_mm(h, p["w1"]) + p["b1"], p["g1"], p["be1"]))
        t = _bn_ref(_mm(t, p["w2"]) + p["b2"], p["g2"], p["be2"])
        h = jax.nn.relu(t + h)
    o = params["out"]
    return _mm(h, o["w"]) + o["b"]


# ---------------------------------------------------------------------------
if __name__ == "__main__":
    key = jax.random.PRNGKey(0)

    def run_case(case_id, *, batch, input_size, output_size, inplanes,
                 hidden_size, output_bias, num_blocks, two_pass_bn,
                 h_chunk=H_CHUNK_DEFAULT):
        kp, kx = jax.random.split(jax.random.fold_in(key, case_id))
        # randomize_bn=True so the residual path is actually exercised
        # (module's zero-init bn2.weight makes every Block an identity map).
        params = make_params(kp, input_size, output_size, inplanes,
                             hidden_size, output_bias, num_blocks,
                             randomize_bn=True)
        packed = pack_params(params)
        x = jax.random.normal(kx, (batch, input_size), jnp.float32)

        fwd = jax.jit(functools.partial(
            residual_network_forward, output_size=output_size,
            two_pass_bn=two_pass_bn, h_chunk=h_chunk))
        y = jax.block_until_ready(fwd(packed, x))

        y_ref = reference_forward(params, x)
        assert y.shape == (batch, output_size)
        assert jnp.allclose(y, y_ref, atol=2e-2, rtol=2e-2), \
            f"case {case_id}: mismatch vs reference"

    # 0) aligned batch, single hidden chunk, fast single-pass BN
    run_case(0, batch=8, input_size=16, output_size=4, inplanes=32,
             hidden_size=64, output_bias=True, num_blocks=2,
             two_pass_bn=False)
    # 1) padded batch (masked BN2 sums + pad-row zeroing), no output bias
    run_case(1, batch=5, input_size=16, output_size=4, inplanes=32,
             hidden_size=64, output_bias=False, num_blocks=1,
             two_pass_bn=False)
    # 2) padded batch with robust two-pass BN variance
    run_case(2, batch=6, input_size=16, output_size=4, inplanes=32,
             hidden_size=64, output_bias=True, num_blocks=1,
             two_pass_bn=True)
    # 3) hidden dimension streamed in chunks (2nd grid axis + fc2 accumulator)
    run_case(3, batch=6, input_size=16, output_size=4, inplanes=32,
             hidden_size=288, output_bias=True, num_blocks=1,
             two_pass_bn=False, h_chunk=128)

    print("KERNEL_OK")
</pallas_src>

<mosaic_0001>
module attributes {stable_mosaic.version = 11 : i64} {
  func.func @kernel(%arg0: i32, %arg1: i32, %arg2: memref<8x128xbf16, #tpu.memory_space<vmem>>, %arg3: memref<128x128xbf16, #tpu.memory_space<vmem>>, %arg4: memref<2x128xf32, #tpu.memory_space<vmem>>, %arg5: memref<1x128x128xbf16, #tpu.memory_space<vmem>>, %arg6: memref<1x2x128xf32, #tpu.memory_space<vmem>>, %arg7: memref<1x128x128xbf16, #tpu.memory_space<vmem>>, %arg8: memref<1x2x128xf32, #tpu.memory_space<vmem>>, %arg9: memref<128x128xbf16, #tpu.memory_space<vmem>>, %arg10: memref<1x128xf32, #tpu.memory_space<vmem>>, %arg11: memref<8x128xf32, #tpu.memory_space<vmem>>, %arg12: memref<8x128xf32, #tpu.memory_space<vmem>>, %arg13: memref<8x128xbf16, #tpu.memory_space<vmem>>) attributes {dimension_semantics = [#tpu.dimension_semantics<arbitrary>, #tpu.dimension_semantics<arbitrary>], iteration_bounds = array<i64: 8, 1>, scalar_prefetch = 0 : i64, scratch_operands = 2 : i64, tpu.core_type = #tpu.core_type<tc>, window_params = [{pipeline_mode = #tpu.pipeline_mode<synchronous>, transform_indices = @transform_0, window_bounds = array<i64: 8, 128>}, {pipeline_mode = #tpu.pipeline_mode<synchronous>, transform_indices = @transform_1, window_bounds = array<i64: 128, 128>}, {pipeline_mode = #tpu.pipeline_mode<synchronous>, transform_indices = @transform_2, window_bounds = array<i64: 2, 128>}, {transform_indices = @transform_3, window_bounds = array<i64: 1, 128, 128>}, {transform_indices = @transform_4, window_bounds = array<i64: 1, 2, 128>}, {transform_indices = @transform_5, window_bounds = array<i64: 1, 128, 128>}, {transform_indices = @transform_6, window_bounds = array<i64: 1, 2, 128>}, {pipeline_mode = #tpu.pipeline_mode<synchronous>, transform_indices = @transform_7, window_bounds = array<i64: 128, 128>}, {pipeline_mode = #tpu.pipeline_mode<synchronous>, transform_indices = @transform_8, window_bounds = array<i64: 1, 128>}, {pipeline_mode = #tpu.pipeline_mode<synchronous>, transform_indices = @transform_9, window_bounds = array<i64: 8, 128>}]} {
    %c0_i32 = arith.constant 0 : i32
    %0 = arith.cmpi eq, %arg0, %c0_i32 : i32
    %c0_i32_0 = arith.constant 0 : i32
    %1 = arith.cmpi eq, %arg1, %c0_i32_0 : i32
    %2 = arith.andi %0, %1 : i1
    %3 = arith.extui %2 : i1 to i32
    %c0_i32_1 = arith.constant 0 : i32
    %4 = arith.cmpi ne, %3, %c0_i32_1 : i32
    scf.if %4 {
      %c0_26 = arith.constant 0 : index
      %c0_27 = arith.constant 0 : index
      %50 = vector.load %arg2[%c0_26, %c0_27] : memref<8x128xbf16, #tpu.memory_space<vmem>>, vector<8x128xbf16>
      %c0_28 = arith.constant 0 : index
      %c0_29 = arith.constant 0 : index
      %51 = vector.load %arg3[%c0_28, %c0_29] : memref<128x128xbf16, #tpu.memory_space<vmem>>, vector<128x128xbf16>
      %cst_30 = arith.constant dense<0.000000e+00> : vector<8x128xf32>
      %52 = tpu.matmul %50, %51, %cst_30 {dimension_numbers = #tpu.dot_dimension_numbers<[1], [0], [0], [1], [0, 0, 1, 1], [], []>} : vector<8x128xbf16>, vector<128x128xbf16>, vector<8x128xf32> -> vector<8x128xf32>
      %c0_31 = arith.constant 0 : index
      %c0_32 = arith.constant 0 : index
      %53 = vector.load %arg4[%c0_31, %c0_32] : memref<2x128xf32, #tpu.memory_space<vmem>>, vector<1x128xf32>
      %c1_33 = arith.constant 1 : index
      %c0_34 = arith.constant 0 : index
      %54 = vector.load %arg4[%c1_33, %c0_34] : memref<2x128xf32, #tpu.memory_space<vmem>>, vector<1x128xf32>
      %cst_35 = arith.constant dense<0.000000e+00> : vector<128xf32>
      %55 = vector.multi_reduction <add>, %52, %cst_35 [0] : vector<8x128xf32> to vector<128xf32>
      %56 = vector.shape_cast %55 : vector<128xf32> to vector<1x128xf32>
      %cst_36 = arith.constant 1.250000e-01 : f32
      %57 = vector.broadcast %cst_36 : f32 to vector<1x128xf32>
      %58 = arith.mulf %56, %57 : vector<1x128xf32>
      %59 = arith.mulf %52, %52 : vector<8x128xf32>
      %cst_37 = arith.constant dense<0.000000e+00> : vector<128xf32>
      %60 = vector.multi_reduction <add>, %59, %cst_37 [0] : vector<8x128xf32> to vector<128xf32>
      %61 = vector.shape_cast %60 : vector<128xf32> to vector<1x128xf32>
      %cst_38 = arith.constant 1.250000e-01 : f32
      %62 = vector.broadcast %cst_38 : f32 to vector<1x128xf32>
      %63 = arith.mulf %61, %62 : vector<1x128xf32>
      %64 = arith.mulf %58, %58 : vector<1x128xf32>
      %65 = arith.subf %63, %64 : vector<1x128xf32>
      %cst_39 = arith.constant 0.000000e+00 : f32
      %66 = vector.broadcast %cst_39 : f32 to vector<1x128xf32>
      %67 = arith.maximumf %65, %66 : vector<1x128xf32>
      %cst_40 = arith.constant 9.99999974E-6 : f32
      %68 = vector.broadcast %cst_40 : f32 to vector<1x128xf32>
      %69 = arith.addf %67, %68 : vector<1x128xf32>
      %70 = math.rsqrt %69 : vector<1x128xf32>
      %71 = arith.mulf %70, %53 : vector<1x128xf32>
      %72 = vector.broadcast %71 : vector<1x128xf32> to vector<8x128xf32>
      %73 = arith.mulf %52, %72 : vector<8x128xf32>
      %74 = arith.mulf %58, %71 : vector<1x128xf32>
      %75 = arith.subf %54, %74 : vector<1x128xf32>
      %76 = vector.broadcast %75 : vector<1x128xf32> to vector<8x128xf32>
      %77 = arith.addf %73, %76 : vector<8x128xf32>
      %cst_41 = arith.constant 0.000000e+00 : f32
      %78 = vector.broadcast %cst_41 : f32 to vector<8x128xf32>
      %79 = arith.maximumf %77, %78 : vector<8x128xf32>
      %c0_42 = arith.constant 0 : index
      %c0_43 = arith.constant 0 : index
      %80 = vector.load %arg12[%c0_42, %c0_43] : memref<8x128xf32, #tpu.memory_space<vmem>>, vector<8x128xf32>
      tpu.vector_store %arg12[%c0_42, %c0_43], %79 {strides = array<i32>} : memref<8x128xf32, #tpu.memory_space<vmem>>, vector<8x128xf32>,
      %81 = arith.truncf %79 : vector<8x128xf32> to vector<8x128xbf16>
      %c0_44 = arith.constant 0 : index
      %c0_45 = arith.constant 0 : index
      %82 = vector.load %arg13[%c0_44, %c0_45] : memref<8x128xbf16, #tpu.memory_space<vmem>>, vector<8x128xbf16>
      tpu.vector_store %arg13[%c0_44, %c0_45], %81 {strides = array<i32>} : memref<8x128xbf16, #tpu.memory_space<vmem>>, vector<8x128xbf16>,
    } else {
    }
    %c0 = arith.constant 0 : index
    %c0_2 = arith.constant 0 : index
    %5 = vector.load %arg13[%c0, %c0_2] : memref<8x128xbf16, #tpu.memory_space<vmem>>, vector<8x128xbf16>
    %c0_3 = arith.constant 0 : index
    %c0_4 = arith.constant 0 : index
    %c0_5 = arith.constant 0 : index
    %6 = vector.load %arg5[%c0_3, %c0_4, %c0_5] : memref<1x128x128xbf16, #tpu.memory_space<vmem>>, vector<1x128x128xbf16>
    %7 = vector.shape_cast %6 : vector<1x128x128xbf16> to vector<128x128xbf16>
    %cst = arith.constant dense<0.000000e+00> : vector<8x128xf32>
    %8 = tpu.matmul %5, %7, %cst {dimension_numbers = #tpu.dot_dimension_numbers<[1], [0], [0], [1], [0, 0, 1, 1], [], []>} : vector<8x128xbf16>, vector<128x128xbf16>, vector<8x128xf32> -> vector<8x128xf32>
    %c0_6 = arith.constant 0 : index
    %c0_7 = arith.constant 0 : index
    %c0_8 = arith.constant 0 : index
    %9 = vector.load %arg6[%c0_6, %c0_7, %c0_8] : memref<1x2x128xf32, #tpu.memory_space<vmem>>, vector<1x1x128xf32>
    %10 = vector.shape_cast %9 : vector<1x1x128xf32> to vector<1x128xf32>
    %c0_9 = arith.constant 0 : index
    %c1 = arith.constant 1 : index
    %c0_10 = arith.constant 0 : index
    %11 = vector.load %arg6[%c0_9, %c1, %c0_10] : memref<1x2x128xf32, #tpu.memory_space<vmem>>, vector<1x1x128xf32>
    %12 = vector.shape_cast %11 : vector<1x1x128xf32> to vector<1x128xf32>
    %cst_11 = arith.constant dense<0.000000e+00> : vector<128xf32>
    %13 = vector.multi_reduction <add>, %8, %cst_11 [0] : vector<8x128xf32> to vector<128xf32>
    %14 = vector.shape_cast %13 : vector<128xf32> to vector<1x128xf32>
    %cst_12 = arith.constant 1.250000e-01 : f32
    %15 = vector.broadcast %cst_12 : f32 to vector<1x128xf32>
    %16 = arith.mulf %14, %15 : vector<1x128xf32>
    %17 = arith.mulf %8, %8 : vector<8x128xf32>
    %cst_13 = arith.constant dense<0.000000e+00> : vector<128xf32>
    %18 = vector.multi_reduction <add>, %17, %cst_13 [0] : vector<8x128xf32> to vector<128xf32>
    %19 = vector.shape_cast %18 : vector<128xf32> to vector<1x128xf32>
    %cst_14 = arith.constant 1.250000e-01 : f32
    %20 = vector.broadcast %cst_14 : f32 to vector<1x128xf32>
    %21 = arith.mulf %19, %20 : vector<1x128xf32>
    %22 = arith.mulf %16, %16 : vector<1x128xf32>
    %23 = arith.subf %21, %22 : vector<1x128xf32>
    %cst_15 = arith.constant 0.000000e+00 : f32
    %24 = vector.broadcast %cst_15 : f32 to vector<1x128xf32>
    %25 = arith.maximumf %23, %24 : vector<1x128xf32>
    %cst_16 = arith.constant 9.99999974E-6 : f32
    %26 = vector.broadcast %cst_16 : f32 to vector<1x128xf32>
    %27 = arith.addf %25, %26 : vector<1x128xf32>
    %28 = math.rsqrt %27 : vector<1x128xf32>
    %29 = arith.mulf %28, %10 : vector<1x128xf32>
    %30 = vector.broadcast %29 : vector<1x128xf32> to vector<8x128xf32>
    %31 = arith.mulf %8, %30 : vector<8x128xf32>
    %32 = arith.mulf %16, %29 : vector<1x128xf32>
    %33 = arith.subf %12, %32 : vector<1x128xf32>
    %34 = vector.broadcast %33 : vector<1x128xf32> to vector<8x128xf32>
    %35 = arith.addf %31, %34 : vector<8x128xf32>
    %cst_17 = arith.constant 0.000000e+00 : f32
    %36 = vector.broadcast %cst_17 : f32 to vector<8x128xf32>
    %37 = arith.maximumf %35, %36 : vector<8x128xf32>
    %38 = arith.truncf %37 : vector<8x128xf32> to vector<8x128xbf16>
    %c0_18 = arith.constant 0 : index
    %c0_19 = arith.constant 0 : index
    %c0_20 = arith.constant 0 : index
    %39 = vector.load %arg7[%c0_18, %c0_19, %c0_20] : memref<1x128x128xbf16, #tpu.memory_space<vmem>>, vector<1x128x128xbf16>
    %40 = vector.shape_cast %39 : vector<1x128x128xbf16> to vector<128x128xbf16>
    %cst_21 = arith.constant dense<0.000000e+00> : vector<8x128xf32>
    %41 = tpu.matmul %38, %40, %cst_21 {dimension_numbers = #tpu.dot_dimension_numbers<[1], [0], [0], [1], [0, 0, 1, 1], [], []>} : vector<8x128xbf16>, vector<128x128xbf16>, vector<8x128xf32> -> vector<8x128xf32>
    %c0_i32_22 = arith.constant 0 : i32
    %42 = arith.cmpi eq, %arg1, %c0_i32_22 : i32
    %43 = arith.extui %42 : i1 to i32
    %c0_i32_23 = arith.constant 0 : i32
    %44 = arith.cmpi ne, %43, %c0_i32_23 : i32
    scf.if %44 {
      %c0_26 = arith.constant 0 : index
      %c0_27 = arith.constant 0 : index
      %50 = vector.load %arg12[%c0_26, %c0_27] : memref<8x128xf32, #tpu.memory_space<vmem>>, vector<8x128xf32>
      %c0_28 = arith.constant 0 : index
      %c0_29 = arith.constant 0 : index
      %c0_30 = arith.constant 0 : index
      %51 = vector.load %arg8[%c0_28, %c0_29, %c0_30] : memref<1x2x128xf32, #tpu.memory_space<vmem>>, vector<1x1x128xf32>
      %52 = vector.shape_cast %51 : vector<1x1x128xf32> to vector<1x128xf32>
      %c0_31 = arith.constant 0 : index
      %c1_32 = arith.constant 1 : index
      %c0_33 = arith.constant 0 : index
      %53 = vector.load %arg8[%c0_31, %c1_32, %c0_33] : memref<1x2x128xf32, #tpu.memory_space<vmem>>, vector<1x1x128xf32>
      %54 = vector.shape_cast %53 : vector<1x1x128xf32> to vector<1x128xf32>
      %cst_34 = arith.constant dense<0.000000e+00> : vector<128xf32>
      %55 = vector.multi_reduction <add>, %41, %cst_34 [0] : vector<8x128xf32> to vector<128xf32>
      %56 = vector.shape_cast %55 : vector<128xf32> to vector<1x128xf32>
      %cst_35 = arith.constant 1.250000e-01 : f32
      %57 = vector.broadcast %cst_35 : f32 to vector<1x128xf32>
      %58 = arith.mulf %56, %57 : vector<1x128xf32>
      %59 = arith.mulf %41, %41 : vector<8x128xf32>
      %cst_36 = arith.constant dense<0.000000e+00> : vector<128xf32>
      %60 = vector.multi_reduction <add>, %59, %cst_36 [0] : vector<8x128xf32> to vector<128xf32>
      %61 = vector.shape_cast %60 : vector<128xf32> to vector<1x128xf32>
      %cst_37 = arith.constant 1.250000e-01 : f32
      %62 = vector.broadcast %cst_37 : f32 to vector<1x128xf32>
      %63 = arith.mulf %61, %62 : vector<1x128xf32>
      %64 = arith.mulf %58, %58 : vector<1x128xf32>
      %65 = arith.subf %63, %64 : vector<1x128xf32>
      %cst_38 = arith.constant 0.000000e+00 : f32
      %66 = vector.broadcast %cst_38 : f32 to vector<1x128xf32>
      %67 = arith.maximumf %65, %66 : vector<1x128xf32>
      %cst_39 = arith.constant 9.99999974E-6 : f32
      %68 = vector.broadcast %cst_39 : f32 to vector<1x128xf32>
      %69 = arith.addf %67, %68 : vector<1x128xf32>
      %70 = math.rsqrt %69 : vector<1x128xf32>
      %71 = arith.mulf %70, %52 : vector<1x128xf32>
      %72 = vector.broadcast %71 : vector<1x128xf32> to vector<8x128xf32>
      %73 = arith.mulf %41, %72 : vector<8x128xf32>
      %74 = arith.mulf %58, %71 : vector<1x128xf32>
      %75 = arith.subf %54, %74 : vector<1x128xf32>
      %76 = vector.broadcast %75 : vector<1x128xf32> to vector<8x128xf32>
      %77 = arith.addf %73, %76 : vector<8x128xf32>
      %78 = arith.addf %77, %50 : vector<8x128xf32>
      %cst_40 = arith.constant 0.000000e+00 : f32
      %79 = vector.broadcast %cst_40 : f32 to vector<8x128xf32>
      %80 = arith.maximumf %78, %79 : vector<8x128xf32>
      %c0_41 = arith.constant 0 : index
      %c0_42 = arith.constant 0 : index
      %81 = vector.load %arg12[%c0_41, %c0_42] : memref<8x128xf32, #tpu.memory_space<vmem>>, vector<8x128xf32>
      tpu.vector_store %arg12[%c0_41, %c0_42], %80 {strides = array<i32>} : memref<8x128xf32, #tpu.memory_space<vmem>>, vector<8x128xf32>,
      %82 = arith.truncf %80 : vector<8x128xf32> to vector<8x128xbf16>
      %c0_43 = arith.constant 0 : index
      %c0_44 = arith.constant 0 : index
      %83 = vector.load %arg13[%c0_43, %c0_44] : memref<8x128xbf16, #tpu.memory_space<vmem>>, vector<8x128xbf16>
      tpu.vector_store %arg13[%c0_43, %c0_44], %82 {strides = array<i32>} : memref<8x128xbf16, #tpu.memory_space<vmem>>, vector<8x128xbf16>,
    } else {
    }
    %c7_i32 = arith.constant 7 : i32
    %45 = arith.cmpi eq, %arg0, %c7_i32 : i32
    %c0_i32_24 = arith.constant 0 : i32
    %46 = arith.cmpi eq, %arg1, %c0_i32_24 : i32
    %47 = arith.andi %45, %46 : i1
    %48 = arith.extui %47 : i1 to i32
    %c0_i32_25 = arith.constant 0 : i32
    %49 = arith.cmpi ne, %48, %c0_i32_25 : i32
    scf.if %49 {
      %c0_26 = arith.constant 0 : index
      %c0_27 = arith.constant 0 : index
      %50 = vector.load %arg13[%c0_26, %c0_27] : memref<8x128xbf16, #tpu.memory_space<vmem>>, vector<8x128xbf16>
      %c0_28 = arith.constant 0 : index
      %c0_29 = arith.constant 0 : index
      %51 = vector.load %arg9[%c0_28, %c0_29] : memref<128x128xbf16, #tpu.memory_space<vmem>>, vector<128x128xbf16>
      %cst_30 = arith.constant dense<0.000000e+00> : vector<8x128xf32>
      %52 = tpu.matmul %50, %51, %cst_30 {dimension_numbers = #tpu.dot_dimension_numbers<[1], [0], [0], [1], [0, 0, 1, 1], [], []>} : vector<8x128xbf16>, vector<128x128xbf16>, vector<8x128xf32> -> vector<8x128xf32>
      %c0_31 = arith.constant 0 : index
      %c0_32 = arith.constant 0 : index
      %53 = vector.load %arg10[%c0_31, %c0_32] : memref<1x128xf32, #tpu.memory_space<vmem>>, vector<1x128xf32>
      %54 = vector.broadcast %53 : vector<1x128xf32> to vector<8x128xf32>
      %55 = arith.addf %52, %54 : vector<8x128xf32>
      %c0_33 = arith.constant 0 : index
      %c0_34 = arith.constant 0 : index
      %56 = vector.load %arg11[%c0_33, %c0_34] : memref<8x128xf32, #tpu.memory_space<vmem>>, vector<8x128xf32>
      tpu.vector_store %arg11[%c0_33, %c0_34], %55 {strides = array<i32>} : memref<8x128xf32, #tpu.memory_space<vmem>>, vector<8x128xf32>,
    } else {
    }
    return
  }
  func.func @transform_0(%arg0: i32, %arg1: i32) -> (i32, i32) {
    %c0_i32 = arith.constant 0 : i32
    %c0_i32_0 = arith.constant 0 : i32
    %c0_i32_1 = arith.constant 0 : i32
    return %c0_i32, %c0_i32_0 : i32, i32
  }
  func.func @transform_1(%arg0: i32, %arg1: i32) -> (i32, i32) {
    %c0_i32 = arith.constant 0 : i32
    %c0_i32_0 = arith.constant 0 : i32
    %c0_i32_1 = arith.constant 0 : i32
    return %c0_i32, %c0_i32_0 : i32, i32
  }
  func.func @transform_2(%arg0: i32, %arg1: i32) -> (i32, i32) {
    %c0_i32 = arith.constant 0 : i32
    %c0_i32_0 = arith.constant 0 : i32
    %c0_i32_1 = arith.constant 0 : i32
    return %c0_i32, %c0_i32_0 : i32, i32
  }
  func.func @transform_3(%arg0: i32, %arg1: i32) -> (i32, i32, i32) {
    %c0_i32 = arith.constant 0 : i32
    %c0_i32_0 = arith.constant 0 : i32
    return %arg0, %c0_i32, %arg1 : i32, i32, i32
  }
  func.func @transform_4(%arg0: i32, %arg1: i32) -> (i32, i32, i32) {
    %c0_i32 = arith.constant 0 : i32
    %c0_i32_0 = arith.constant 0 : i32
    return %arg0, %c0_i32, %arg1 : i32, i32, i32
  }
  func.func @transform_5(%arg0: i32, %arg1: i32) -> (i32, i32, i32) {
    %c0_i32 = arith.constant 0 : i32
    %c0_i32_0 = arith.constant 0 : i32
    return %arg0, %arg1, %c0_i32 : i32, i32, i32
  }
  func.func @transform_6(%arg0: i32, %arg1: i32) -> (i32, i32, i32) {
    %c0_i32 = arith.constant 0 : i32
    %c0_i32_0 = arith.constant 0 : i32
    %c0_i32_1 = arith.constant 0 : i32
    return %arg0, %c0_i32, %c0_i32_0 : i32, i32, i32
  }
  func.func @transform_7(%arg0: i32, %arg1: i32) -> (i32, i32) {
    %c0_i32 = arith.constant 0 : i32
    %c0_i32_0 = arith.constant 0 : i32
    %c0_i32_1 = arith.constant 0 : i32
    return %c0_i32, %c0_i32_0 : i32, i32
  }
  func.func @transform_8(%arg0: i32, %arg1: i32) -> (i32, i32) {
    %c0_i32 = arith.constant 0 : i32
    %c0_i32_0 = arith.constant 0 : i32
    %c0_i32_1 = arith.constant 0 : i32
    return %c0_i32, %c0_i32_0 : i32, i32
  }
  func.func @transform_9(%arg0: i32, %arg1: i32) -> (i32, i32) {
    %c0_i32 = arith.constant 0 : i32
    %c0_i32_0 = arith.constant 0 : i32
    %c0_i32_1 = arith.constant 0 : i32
    return %c0_i32, %c0_i32_0 : i32, i32
  }
}

</mosaic_0001>

<bundles_post_ra>
// kernel: residual_network_forward.1
= control target key start
LH: loop header
LB: loop body
LE: loop exit
PB: predicated region body
PF: predicated region fallthrough
CT: control target
= control target key end

     0   :  { %s2160_s0 = inlined_call_operand.vmem [shape: bf16[8,128], index: 0, kind: input, shape index: {}]   ;;  %s2161_s1 = inlined_call_operand.hbm [shape: bf16[128,128], index: 1, kind: input, shape index: {}]   ;;  %s2162_s2 = inlined_call_operand.hbm [shape: f32[2,128], index: 2, kind: input, shape index: {}]   ;;  %s2163_s3 = inlined_call_operand.hbm [shape: bf16[8,128,128], index: 3, kind: input, shape index: {}]   ;;  %s2164_s4 = inlined_call_operand.vmem [shape: f32[8,2,128], index: 4, kind: input, shape index: {}]   ;;  %s2165_s5 = inlined_call_operand.hbm [shape: bf16[8,128,128], index: 5, kind: input, shape index: {}]   ;;  %s2166_s6 = inlined_call_operand.vmem [shape: f32[8,2,128], index: 6, kind: input, shape index: {}]   ;;  %s2167_s7 = inlined_call_operand.hbm [shape: bf16[128,128], index: 7, kind: input, shape index: {}]   ;;  %s2168_s8 = inlined_call_operand.hbm [shape: f32[1,128], index: 8, kind: input, shape index: {}]   ;;  %s2169_s9 = inlined_call_operand.vmem [shape: f32[8,128], index: 9, kind: output, shape index: {}]  }
   0x1   :  { %2187 = sst [smem:[#allocation21_spill]] %s2160_s0 }
   0x2   :  { %2188 = sst [smem:[#allocation22_spill]] %s2161_s1 }
   0x3   :  { %2189 = sst [smem:[#allocation23_spill]] %s2162_s2 }
   0x4   :  { %2190 = sst [smem:[#allocation24_spill]] %s2163_s3 }
   0x5   :  { %2191 = sst [smem:[#allocation25_spill]] %s2164_s4 }
   0x6   :  { %2192 = sst [smem:[#allocation26_spill]] %s2166_s6 }
   0x7   :  { %2193 = sst [smem:[#allocation27_spill]] %s2169_s9 }
   0x8   :  { %14 = vsyncpa [#allocation5], 0 }
   0x9   :  { %15 = vsyncpa [#allocation7], 0 }
   0xa   :  { %16 = vsyncpa [#allocation12], 0  ;;  %s1819_s30 = smov 0   ;;  %s1821_s10 = smov 0  }
   0xb   :  { %s1823_s11 = smov 0   ;;  %s1825_s12 = smov 0  }
   0xc   :  { %s1827_s13 = smov 0   ;;  %s1829_s14 = smov 0  }
   0xd LB: > { %2194 = sst [smem:[#allocation18_spill]] %s1741_s11  ;;  %s2174_s15 = sadd.s32 4294967295, %s1753_s14   ;;  %s1753_s14 = sphi %s1829_s14, %s22_s14   ;;  %s1749_s13 = sphi %s1827_s13, %s2227_s13   ;;  %s1745_s12 = sphi %s1825_s12, %s2226_s12   ;;  %s1741_s11 = sphi %s1823_s11, %s2222_s11   ;;  %s1737_s10 = sphi %s1821_s10, %s2225_s10   ;;  %s1733_s30 = sphi %s1819_s30, %s2224_s30  }
   0xe   : > { %p119_p0 = scmp.ne.s32.totalorder %s1737_s10, %s1733_s30  ;;  %p1851_p1 = scmp.eq.s32.totalorder %s2174_s15, 0 }
   0xf   : > { %p1190_p2 = scmp.ge.s32.totalorder %s1753_s14, 1  ;;  %p275_p3 = scmp.lt.s32.totalorder %s1753_s14, 9 }
  0x10   : > { %s2195_s16 = scalar_select %p1851_p1, 1, 0 }
  0x11   : > { %p1859_p4 = por %p1851_p1, %p119_p0  ;;  %p1863_p5 = pnand %p1190_p2, %p275_p3 }
  0x12   : > { %s1755_s19 = smov [#allocation4]   ;;  %s1756_s22 = smov [#allocation6]  }
  0x13   : > { %s2196_s17 = scalar_select %p1859_p4, 1, 0 }
  0x14   : > { %s2197_s18 = scalar_select %p1863_p5, 1, 0 }
  0x15   : > { %s290_s20 = sshll.u32 %s1755_s19, 4  ;;  %p1388_p6 = pneg %p1863_p5  ;;  %s291_s20 = int_to_ptr.vmem [resolvable:$true] %s290_s20 }
  0x16   : > { %s304_s23 = sshll.u32 %s1756_s22, 4  ;;  %s2199_s1 = sld [smem:[#allocation22_spill]]  ;;  %s1875_s23 = int_to_ptr.vmem [resolvable:$true] %s304_s23 }
  0x17   : > { %p1871_p7 = pnand %p1388_p6, %p1851_p1 }
  0x19   : > { %s2198_s21 = scalar_select %p1871_p7, 1, 0 }
  0x1a   : > { %p1885_p9 = pneg %p1871_p7 }
  0x1c   : > { %s1515_s26 = scalar_lea.hbm %s2199_s1, 1024 }
  0x1d   : > { %p1516_p8 = scmp.ne.s32.totalorder %s2199_s1, %s1515_s26  ;;  %p1522_p12 = scmp.lt.u32.totalorder %s1515_s26, %s2199_s1 }
  0x1f   : > { %p1518_p10 = pnand %p1885_p9, %p1516_p8 }
  0x21   : > { %p1519_p11 = pneg %p1518_p10 }
  0x23   : > { %p1524_p13 = pnand %p1522_p12, %p1519_p11 }
  0x25   : > { %1527 = shalt.err (!%p1524_p13)
}
  0x26   : > { %s1528_s22 = scalar_lea.vmem %s291_s20, 1024  ;;  %p1536_p6 = scmp.lt.s32.totalorder %s291_s20, %s291_s20 }
  0x27   : > { %p1529_p0 = scmp.ne.s32.totalorder %s291_s20, %s1528_s22  ;;  %p1537_p4 = scmp.lt.s32.totalorder %s1528_s22, %s1528_s22 }
  0x29   : > { %p1531_p2 = pnand %p1529_p0, %p1885_p9  ;;  %p1538_p1 = por %p1537_p4, %p1536_p6 }
  0x2b   : > { %p1532_p3 = pneg %p1531_p2 }
  0x2d   : > { %p1539_p5 = pnand %p1538_p1, %p1532_p3 }
  0x2f   : > { %1542 = shalt.err (!%p1539_p5)
}
  0x30   : > { %s2175_s24 = smov 64   ;;  %s2177_s25 = smov 4  }
  0x31   : > { %1391 = dma.hbm_to_vmem [thread:$0]  (!%p1871_p7), %s2199_s1, 1024, %s291_s20, [#allocation5], %s2175_s24, %s2175_s24, %s2177_s25  }
  0x32   : > { %s2201_s2 = sld [smem:[#allocation23_spill]] }
  0x38   : > { %s1543_s19 = scalar_lea.hbm %s2201_s2, 32 }
  0x39   : > { %p1544_p1 = scmp.ne.s32.totalorder %s2201_s2, %s1543_s19  ;;  %p1550_p8 = scmp.lt.u32.totalorder %s1543_s19, %s2201_s2 }
  0x3b   : > { %p1546_p4 = pnand %p1544_p1, %p1885_p9 }
  0x3d   : > { %p1547_p5 = pneg %p1546_p4 }
  0x3f   : > { %p1552_p10 = pnand %p1550_p8, %p1547_p5 }
  0x41   : > { %1555 = shalt.err (!%p1552_p10)
}
  0x42   : > { %s1556_s20 = scalar_lea.vmem %s1875_s23, 32  ;;  %p1564_p0 = scmp.lt.s32.totalorder %s1875_s23, %s1875_s23 }
  0x43   : > { %p1557_p11 = scmp.ne.s32.totalorder %s1875_s23, %s1556_s20  ;;  %p1565_p2 = scmp.lt.s32.totalorder %s1556_s20, %s1556_s20 }
  0x45   : > { %p1559_p12 = pnand %p1557_p11, %p1885_p9  ;;  %p1566_p3 = por %p1565_p2, %p1564_p0 }
  0x47   : > { %p1560_p13 = pneg %p1559_p12 }
  0x49   : > { %p1567_p6 = pnand %p1566_p3, %p1560_p13 }
  0x4b   : > { %1570 = shalt.err (!%p1567_p6)
}
  0x4c   : > { %1394 = dma.hbm_to_vmem [thread:$0]  (!%p1871_p7), %s2201_s2, 32, %s1875_s23, [#allocation7]  }
  0x4d   : > { %s34_s15 = sadd.s32 1, %s1749_s13  ;;  %s106_s26 = sadd.s32 1, %s1741_s11 }
  0x4e   : > { %p36_p1 = scmp.ge.s32.totalorder %s34_s15, 8  ;;  %p113_p4 = scmp.ne.s32.totalorder %s1741_s11, %s1737_s10 }
  0x4f   : > { %p114_p5 = scmp.eq.s32.totalorder %s1753_s14, 0  ;;  %p1412_p8 = scmp.lt.s32.totalorder %s1753_s14, 8 }
  0x50   : > { %s2229_s15 = smov (%p36_p1, %s34_s15), 0  ;;  %s339_s27 = sand.u32 1, %s1753_s14  }
  0x51   : > { %2202 = sst [smem:[#allocation19_spill]] %s2229_s15  ;;  %p115_p10 = por %p114_p5, %p113_p4 }
  0x52   : > { %s101_s28 = ssub.s32 %s1749_s13, %s2229_s15  ;;  %s341_s30 = sand.u32 1, %s1741_s11  }
  0x53   : > { %p104_p11 = scmp.eq.s32.totalorder %s101_s28, 0  ;;  %s1939_s19 = sshll.u32 %s341_s30, 6 }
  0x54   : > { %s2179_s23 = sshll.u32 %s1749_s13, 10  ;;  %s2204_s3 = sld [smem:[#allocation24_spill]] }
  0x55   : > { %s1943_s22 = scalar_select %p104_p11, %s1741_s11, %s106_s26  }
  0x56   : > { %s343_s24 = scalar_lea.vmem [#allocation8], %s1939_s19  ;;  %p1955_p12 = pnand %p1412_p8, %p115_p10 }
  0x57   : > { %2203 = sst [smem:[#allocation20_spill]] %s1943_s22  ;;  %s351_s25 = sshll.u32 %s343_s24, 4  ;;  %s1959_s25 = int_to_ptr.vmem [resolvable:$true] %s351_s25 }
  0x58   : > { %s2205_s28 = scalar_select %p1955_p12, 1, 0 }
  0x59   : > { %s1759_s26 = smov [#allocation10]   ;;  %s1963_s20 = scalar_lea.sflag [#allocation5], %s339_s27 }
  0x5a   : > { %s1950_s9 = scalar_lea.hbm %s2204_s3, %s2179_s23  ;;  %s1961_s30 = sshll.u32 %s1759_s26, 4  ;;  %s315_s30 = int_to_ptr.vmem [resolvable:$true] %s1961_s30 }
  0x5b   : > { %s1571_s0 = scalar_lea.hbm %s1950_s9, 1024  ;;  %p2183_p0 = pneg %p1955_p12 }
  0x5c   : > { %p1572_p13 = scmp.ne.s32.totalorder %s1950_s9, %s1571_s0  ;;  %s1576_s1 = scalar_lea.hbm %s2204_s3, 8192 }
  0x5d   : > { %p1577_p6 = scmp.lt.u32.totalorder %s1950_s9, %s2204_s3  ;;  %p1578_p1 = scmp.lt.u32.totalorder %s1576_s1, %s1571_s0 }
  0x5e   : > { %p1574_p2 = pnand %p2183_p0, %p1572_p13  ;;  %p1580_p5 = scmp.lt.u32.totalorder %s1571_s0, %s1950_s9 }
  0x5f   : > { %p1579_p4 = por %p1578_p1, %p1577_p6 }
  0x60   : > { %p1575_p3 = pneg %p1574_p2 }
  0x61   : > { %p1581_p8 = por %p1580_p5, %p1579_p4 }
  0x63   : > { %p1582_p10 = pnand %p1581_p8, %p1575_p3 }
  0x65   : > { %1585 = shalt.err (!%p1582_p10)
}
  0x66   : > { %s1586_s27 = scalar_lea.vmem %s1959_s25, 1024  ;;  %s1760_s23 = smov [#allocation8]  }
  0x67   : > { %p1587_p11 = scmp.ne.s32.totalorder %s1959_s25, %s1586_s27  ;;  %s1591_s26 = sshll.u32 %s1760_s23, 4  ;;  %s1592_s26 = int_to_ptr.vmem [resolvable:$false] %s1591_s26 }
  0x68   : > { %s1593_s2 = scalar_lea.vmem %s1592_s26, 2048  ;;  %p1594_p7 = scmp.lt.s32.totalorder %s1959_s25, %s1592_s26 }
  0x69   : > { %p1589_p13 = pnand %p1587_p11, %p2183_p0  ;;  %p1595_p6 = scmp.lt.s32.totalorder %s1593_s2, %s1586_s27 }
  0x6b   : > { %p1590_p2 = pneg %p1589_p13  ;;  %p1596_p1 = por %p1595_p6, %p1594_p7 }
  0x6d   : > { %p1597_p4 = pnand %p1596_p1, %p1590_p2 }
  0x6f   : > { %1600 = shalt.err (!%p1597_p4)
}
  0x70   : > { %s2206_s1 = smov 4   ;;  %s2207_s15 = smov 64  }
  0x71   : > { %1404 = dma.hbm_to_vmem [thread:$0]  (!%p1955_p12), %s1950_s9, 1024, %s1959_s25, %s1963_s20, %s2207_s15, %s2207_s15, %s2206_s1  }
  0x72   : > { %s1601_s23 = scalar_lea.hbm %s2167_s7, 1024 }
  0x73   : > { %p1602_p7 = scmp.ne.s32.totalorder %s2167_s7, %s1601_s23  ;;  %p1608_p8 = scmp.lt.u32.totalorder %s1601_s23, %s2167_s7 }
  0x75   : > { %p1604_p3 = pnand %p1602_p7, %p1885_p9 }
  0x77   : > { %p1605_p5 = pneg %p1604_p3 }
  0x79   : > { %p1610_p10 = pnand %p1608_p8, %p1605_p5 }
  0x7b   : > { %1613 = shalt.err (!%p1610_p10)
}
  0x7c   : > { %s1614_s22 = scalar_lea.vmem %s315_s30, 1024  ;;  %p1622_p6 = scmp.lt.s32.totalorder %s315_s30, %s315_s30 }
  0x7d   : > { %p1615_p11 = scmp.ne.s32.totalorder %s315_s30, %s1614_s22  ;;  %p1623_p1 = scmp.lt.s32.totalorder %s1614_s22, %s1614_s22 }
  0x7f   : > { %p1617_p13 = pnand %p1615_p11, %p1885_p9  ;;  %p1624_p4 = por %p1623_p1, %p1622_p6 }
  0x81   : > { %p1618_p2 = pneg %p1617_p13 }
  0x83   : > { %p1625_p0 = pnand %p1624_p4, %p1618_p2 }
  0x85   : > { %1628 = shalt.err (!%p1625_p0)
}
  0x86   : > { %p2208_p7 = scmp.ne.s32.totalorder %s2198_s21, 0  ;;  %s1761_s9 = smov [#allocation11]  }
  0x87   : > { %s328_s0 = sshll.u32 %s1761_s9, 4  ;;  %s2209_s24 = sshll.u32 %s1749_s13, 10  ;;  %s329_s0 = int_to_ptr.vmem [resolvable:$true] %s328_s0 }
  0x88   : > { %1397 = dma.hbm_to_vmem [thread:$0]  (!%p2208_p7), %s2167_s7, 1024, %s315_s30, [#allocation7], %s2207_s15, %s2207_s15, %s2206_s1  }
  0x89   : > { %s2021_s27 = scalar_lea.hbm %s2165_s5, %s2209_s24  ;;  %s1629_s11 = scalar_lea.hbm %s2168_s8, 16 }
  0x8a   : > { %p1630_p0 = scmp.ne.s32.totalorder %s2168_s8, %s1629_s11  ;;  %p1636_p8 = scmp.lt.u32.totalorder %s1629_s11, %s2168_s8 }
  0x8c   : > { %p1632_p3 = pnand %p1630_p0, %p1885_p9 }
  0x8e   : > { %p1633_p5 = pneg %p1632_p3 }
  0x90   : > { %p1638_p10 = pnand %p1636_p8, %p1633_p5 }
  0x92   : > { %1641 = shalt.err (!%p1638_p10)
}
  0x93   : > { %s1642_s25 = scalar_lea.vmem %s329_s0, 16  ;;  %s1649_s9 = scalar_lea.vmem %s329_s0, 32 }
  0x94   : > { %p1643_p11 = scmp.ne.s32.totalorder %s329_s0, %s1642_s25  ;;  %p1650_p6 = scmp.lt.s32.totalorder %s329_s0, %s329_s0 }
  0x95   : > { %p1651_p1 = scmp.lt.s32.totalorder %s1649_s9, %s1642_s25 }
  0x96   : > { %p1645_p13 = pnand %p1643_p11, %p1885_p9 }
  0x97   : > { %p1652_p4 = por %p1651_p1, %p1650_p6 }
  0x98   : > { %p1646_p2 = pneg %p1645_p13 }
  0x9a   : > { %p1653_p12 = pnand %p1652_p4, %p1646_p2 }
  0x9c   : > { %1656 = shalt.err (!%p1653_p12)
}
  0x9d   : > { %1400 = dma.hbm_to_vmem [thread:$0]  (!%p2208_p7), %s2168_s8, 16, %s329_s0, [#allocation12]  }
  0x9e   : > { %s375_s11 = scalar_lea.vmem [#allocation9], %s1939_s19  ;;  %s1657_s24 = scalar_lea.hbm %s2021_s27, 1024 }
  0x9f   : > { %s384_s29 = sshll.u32 %s375_s11, 4  ;;  %p1658_p9 = scmp.ne.s32.totalorder %s2021_s27, %s1657_s24  ;;  %s2042_s29 = int_to_ptr.vmem [resolvable:$true] %s384_s29 }
  0xa0   : > { %p2210_p0 = scmp.ne.s32.totalorder %s2205_s28, 0  ;;  %s1662_s22 = scalar_lea.hbm %s2165_s5, 8192 }
  0xa1   : > { %p1663_p8 = scmp.lt.u32.totalorder %s2021_s27, %s2165_s5  ;;  %p1664_p10 = scmp.lt.u32.totalorder %s1662_s22, %s1657_s24 }
  0xa2   : > { %p2211_p12 = pneg %p2210_p0  ;;  %p1666_p11 = scmp.lt.u32.totalorder %s1657_s24, %s2021_s27 }
  0xa3   : > { %p1665_p7 = por %p1664_p10, %p1663_p8 }
  0xa4   : > { %p1660_p3 = pnand %p1658_p9, %p2211_p12 }
  0xa5   : > { %p1667_p13 = por %p1666_p11, %p1665_p7 }
  0xa6   : > { %p1661_p5 = pneg %p1660_p3 }
  0xa8   : > { %p1668_p2 = pnand %p1667_p13, %p1661_p5 }
  0xaa   : > { %1671 = shalt.err (!%p1668_p2)
}
  0xab   : > { %s1672_s19 = scalar_lea.vmem %s2042_s29, 1024  ;;  %p2212_p1 = pmov %p2211_p12 }
  0xac   : > { %p1673_p6 = scmp.ne.s32.totalorder %s2042_s29, %s1672_s19  ;;  %s1762_s0 = smov [#allocation9]  }
  0xad   : > { %s1677_s30 = sshll.u32 %s1762_s0, 4  ;;  %s1678_s30 = int_to_ptr.vmem [resolvable:$false] %s1677_s30 }
  0xae   : > { %p1675_p4 = pnand %p1673_p6, %p2212_p1  ;;  %s1679_s3 = scalar_lea.vmem %s1678_s30, 2048 }
  0xaf   : > { %p1680_p12 = scmp.lt.s32.totalorder %s2042_s29, %s1678_s30  ;;  %p1681_p3 = scmp.lt.s32.totalorder %s1679_s3, %s1672_s19 }
  0xb0   : > { %p1676_p9 = pneg %p1675_p4 }
  0xb1   : > { %p1682_p8 = por %p1681_p3, %p1680_p12 }
  0xb3   : > { %p1683_p10 = pnand %p1682_p8, %p1676_p9 }
  0xb5   : > { %1686 = shalt.err (!%p1683_p10)
}
  0xb6   : > { %1407 = dma.hbm_to_vmem [thread:$0]  (!%p2210_p0), %s2021_s27, 1024, %s2042_s29, %s1963_s20, %s2207_s15, %s2207_s15, %s2206_s1  }
  0xb7   : > { %p2213_p5 = scmp.ne.s32.totalorder %s2197_s18, 0 }
  0xb8   : > { %p2214_p7 = scmp.ne.s32.totalorder (!%p2213_p5), %s2195_s16, 0 }
  0xb9   : > { %403 = sbr.rel (%p2213_p5) target bundleno = 1276 (0x4fc), region = 56 }
  0xc0   : > { %1712 = dma.done.wait (%p2214_p7), [#allocation5], 1024  }
  0xc1   : > { %1714 = vsyncadd (%p2214_p7), [#allocation5], 4294966272 }
  0xc2   : > { %1716 = dma.done.wait (%p2214_p7), [#allocation7], 32  }
  0xc3   : > { %1718 = vsyncadd (%p2214_p7), [#allocation7], 4294967264  ;;  %s2215_s28 = sadd.s32 4294967295, %s1753_s14   ;;  %s415_s1 = sand.u32 1, %s1737_s10  }
  0xc4   : > { %s413_s20 = sand.u32 1, %s2215_s28   ;;  %s1205_s18 = sshll.u32 %s415_s1, 6 }
  0xc5   : > { %s414_s15 = scalar_lea.sflag [#allocation5], %s413_s20  ;;  %s2084_s27 = scalar_lea.vmem [#allocation8], %s1205_s18 }
  0xc6   : > { %p2216_p0 = scmp.ne.s32.totalorder %s2196_s17, 0 }
  0xc8   : > { %1720 = dma.done.wait (%p2216_p0), %s414_s15, 2048  }
  0xc9   : > { %1722 = vsyncadd (%p2216_p0), %s414_s15, 4294965248  ;;  %s2090_s25 = scalar_lea.vmem [#allocation9], %s1205_s18 }
  0xca   : > { %1724 = dma.done.wait (%p2214_p7), [#allocation7], 1024  }
  0xcb   : > { %1726 = vsyncadd (%p2214_p7), [#allocation7], 4294966272 }
  0xcc   : > { %1728 = dma.done.wait (%p2214_p7), [#allocation12], 16  }
  0xcd   : > { %1730 = vsyncadd (%p2214_p7), [#allocation12], 4294967280  ;;  %p480_p11 = scmp.lt.s32.totalorder %s1745_s12, 7  ;;  %p493_p13 = scmp.eq.s32.totalorder %s1745_s12, 0 }
  0xce   : > { %s2217_s11 = sld [smem:[#allocation25_spill]]  ;;  %s2218_s23 = sld [smem:[#allocation26_spill]]  ;;  %v1477_v0 = vld [vmem:[#allocation4] sm:$0xff] (%p493_p13)   ;;  %v1763_v1 = vmov (%p493_p13), 0.0   ;;  %v1478_v2 = vld [vmem:[#allocation4 + $0x8] sm:$0xff] (%p493_p13)   ;;  %vm1764_vm0 = vmmov (%p493_p13), 0   ;;  %v627_v33 = vlaneseq (%p493_p13) }
  0xcf   : > { %s481_s17 = scalar_select %p480_p11, %s1745_s12, 7 }
  0xd0   : > { %498 = sbr.rel (!%p493_p13) target bundleno = 500 (0x1f4), region = 84  ;;  %1288 = vmatprep.subr.bf16.mxu0 (%p493_p13), %v1763_v1  ;;  %1304 = vmatprep.mubr.msk.bf16.mxu0 (%p493_p13), %vm1764_vm0, %v1763_v1  ;;  %v1479_v3 = vld [vmem:[#allocation4 + $0x10] sm:$0xff] (%p493_p13)   ;;  %v1480_v4 = vld [vmem:[#allocation4 + $0x18] sm:$0xff] (%p493_p13)   ;;  %v1481_v5 = vld [vmem:[#allocation4 + $0x20] sm:$0xff] (%p493_p13)   ;;  %s2219_s2 = sld [smem:[#allocation21_spill]] (%p493_p13)  ;;  %v628_v34 = vshrl.u32 (%p493_p13), %v627_v33, 7 }
  0xd1   : > { %s1209_s9 = sshll.u32 %s481_s17, 1  ;;  %1289 = vmatpush3.bf16.msra.mxu0 (%p493_p13), %v1477_v0  ;;  %v1482_v6 = vld [vmem:[#allocation4 + $0x28] sm:$0xff] (%p493_p13)   ;;  %v1483_v7 = vld [vmem:[#allocation4 + $0x30] sm:$0xff] (%p493_p13)   ;;  %v1484_v8 = vld [vmem:[#allocation4 + $0x38] sm:$0xff] (%p493_p13)  }
  0xd2   : > { %1290 = vmatprep.subr.bf16.mxu0 (%p493_p13), %v1763_v1  ;;  %v604_v35 = vld [vmem:[#allocation6] sm:$0x1] (%p493_p13)  ;;  %v629_v36 = vsub.s32 (%p493_p13), 0, %v628_v34  ;;  %v605_v39 = vld [vmem:[#allocation6 + $0x1] sm:$0x1] (%p493_p13) }
  0xd4   : > { %s2106_s29 = scalar_lea.vmem %s2217_s11, %s1209_s9  ;;  %s2111_s22 = scalar_lea.vmem %s2218_s23, %s1209_s9 }
  0xd5   : > { %1291 = vmatpush3.bf16.msra.mxu0 (%p493_p13), %v1478_v2 }
  0xd6   : > { %1292 = vmatprep.subr.bf16.mxu0 (%p493_p13), %v1763_v1  ;;  %v499_v9 = vld [vmem:[%s2219_s2] sm:$0xf] (%p493_p13) }
  0xd9   : > { %1293 = vmatpush3.bf16.msra.mxu0 %v1479_v3 }
  0xda   : > { %1294 = vmatprep.subr.bf16.mxu0 %v1763_v1 }
  0xdd   : > { %1295 = vmatpush3.bf16.msra.mxu0 %v1480_v4 }
  0xde   : > { %1296 = vmatprep.subr.bf16.mxu0 %v1763_v1 }
  0xe1   : > { %1297 = vmatpush3.bf16.msra.mxu0 %v1481_v5 }
  0xe2   : > { %1298 = vmatprep.subr.bf16.mxu0 %v1763_v1 }
  0xe5   : > { %1299 = vmatpush3.bf16.msra.mxu0 %v1482_v6 }
  0xe6   : > { %1300 = vmatprep.subr.bf16.mxu0 %v1763_v1 }
  0xe9   : > { %1301 = vmatpush3.bf16.msra.mxu0 %v1483_v7 }
  0xea   : > { %1302 = vmatprep.subr.bf16.mxu0 %v1763_v1 }
  0xed   : > { %1303 = vmatpush3.bf16.msra.mxu0 %v1484_v8 }
  0xf0   : > { %1305 = vmatmul.mubr.bf16.vlgmr.msra.gmra.mrb[0].mxu0 %v499_v9 }
 0x1c3   : > { %v598_v10 = vpop.f32.mrb[0].mxu0 }
 0x1c4   : > { %v606_v11 = vrot.slane %v598_v10, 4  ;;  %v613_v12 = vmul.f32 %v598_v10, %v598_v10  ;;  %v1306_v13 = vpop.f32.mrb[1].mxu0 }
 0x1c5   : > { %v601_v14 = vpop.f32.mrb[2].mxu0 }
 0x1c6   : > { %v607_v15 = vadd.f32 %v606_v11, %v598_v10  ;;  %v614_v16 = vrot.slane %v613_v12, 4  ;;  %v1307_v17 = vpop.f32.mrb[3].mxu0 }
 0x1c8   : > { %v608_v18 = vrot.slane %v607_v15, 2  ;;  %v615_v19 = vadd.f32 %v614_v16, %v613_v12 }
 0x1ca   : > { %v609_v20 = vadd.f32 %v608_v18, %v607_v15  ;;  %v616_v21 = vrot.slane %v615_v19, 2 }
 0x1cc   : > { %v610_v22 = vrot.slane %v609_v20, 1  ;;  %v617_v23 = vadd.f32 %v616_v21, %v615_v19 }
 0x1ce   : > { %v611_v24 = vadd.f32 %v610_v22, %v609_v20  ;;  %v618_v25 = vrot.slane %v617_v23, 1 }
 0x1d0   : > { %v612_v26 = vmul.f32 0.125, %v611_v24  ;;  %v619_v27 = vadd.f32 %v618_v25, %v617_v23 }
 0x1d2   : > { %v620_v28 = vmul.f32 0.125, %v619_v27  ;;  %v621_v29 = vmul.f32 %v612_v26, %v612_v26 }
 0x1d4   : > { %v622_v30 = vsub.f32 %v620_v28, %v621_v29 }
 0x1d6   : > { %v623_v31 = vmax.f32 %v622_v30, 0.0 }
 0x1d8   : > { %v624_v32 = vadd.f32 1e-05, %v623_v31 }
 0x1da   : > { %1485 = vrsqrt.f32 %v624_v32 }
 0x1e4   : > { %v1486_v37 = vpop.eup %1485 }
 0x1e5   : > { %v626_v38 = vmul.f32 %v1486_v37, %v604_v35 }
 0x1e7   : > { %v630_v40 = vrot.slane %v626_v38, %v629_v36  ;;  %v632_v41 = vmul.f32 %v626_v38, %v612_v26 }
 0x1e9   : > { %v633_v42 = vsub.f32 %v605_v39, %v632_v41  ;;  %v631_v43 = vmul.f32 %v630_v40, %v598_v10 }
 0x1eb   : > { %v637_v44 = vrot.slane %v633_v42, %v629_v36 }
 0x1ed   : > { %v638_v45 = vadd.f32 %v637_v44, %v631_v43 }
 0x1ef   : > { %v639_v46 = vmax.f32 %v638_v45, 0.0 }
 0x1f1   : > { %640 = vst [vmem:[#allocation2] sm:$0xff] %v639_v46  ;;  %v641_v47 = vpack.c.bf16 %v639_v46, %v639_v46 }
 0x1f3   : > { %642 = vst [vmem:[#allocation3] sm:$0xf] %v641_v47 }
 0x1f4 PF: > { %v1487_v48 = vld [vmem:[%s2084_s27] sm:$0xff]   ;;  %v1765_v49 = vmov 0.0   ;;  %v1488_v50 = vld [vmem:[%s2084_s27 + $0x8] sm:$0xff]   ;;  %vm1766_vm1 = vmmov 0   ;;  %v1489_v51 = vld [vmem:[%s2084_s27 + $0x10] sm:$0xff]   ;;  %v771_v25 = vlaneseq  ;;  %p933_p2 = scmp.eq.s32.totalorder %s1745_s12, 7 }
 0x1f5   : > { %1308 = vmatprep.subr.bf16.mxu0 %v1765_v49  ;;  %1328 = vmatprep.subr.bf16.mxu1 %v1765_v49  ;;  %v1490_v52 = vld [vmem:[%s2084_s27 + $0x18] sm:$0xff]   ;;  %v1491_v53 = vld [vmem:[%s2084_s27 + $0x20] sm:$0xff]   ;;  %v1492_v54 = vld [vmem:[%s2084_s27 + $0x28] sm:$0xff]   ;;  %vm1768_vm2 = vmmov (%p933_p2), 0   ;;  %s2220_s0 = sld [smem:[#allocation27_spill]] (%p933_p2) }
 0x1f6   : > { %1309 = vmatpush3.bf16.msra.mxu0 %v1487_v48  ;;  %1324 = vmatprep.mubr.msk.bf16.mxu0 %vm1766_vm1, %v1765_v49  ;;  %v1493_v55 = vld [vmem:[%s2084_s27 + $0x30] sm:$0xff]   ;;  %v1494_v56 = vld [vmem:[%s2084_s27 + $0x38] sm:$0xff]   ;;  %v1495_v58 = vld [vmem:[%s2090_s25] sm:$0xff]   ;;  %v772_v26 = vshrl.u32 %v771_v25, 7 }
 0x1f7   : > { %1310 = vmatprep.subr.bf16.mxu0 %v1765_v49  ;;  %1344 = vmatprep.mubr.msk.bf16.mxu1 %vm1766_vm1, %v1765_v49  ;;  %v1496_v59 = vld [vmem:[%s2090_s25 + $0x8] sm:$0xff]   ;;  %v1497_v60 = vld [vmem:[%s2090_s25 + $0x10] sm:$0xff]   ;;  %v1498_v61 = vld [vmem:[%s2090_s25 + $0x18] sm:$0xff]  }
 0x1f8   : > { %1329 = vmatpush3.bf16.msra.mxu1 %v1495_v58  ;;  %v1499_v62 = vld [vmem:[%s2090_s25 + $0x20] sm:$0xff]   ;;  %v1500_v63 = vld [vmem:[%s2090_s25 + $0x28] sm:$0xff]   ;;  %v1501_v0 = vld [vmem:[%s2090_s25 + $0x30] sm:$0xff]   ;;  %v773_v28 = vsub.s32 0, %v772_v26 }
 0x1f9   : > { %1330 = vmatprep.subr.bf16.mxu1 %v1765_v49  ;;  %v1502_v1 = vld [vmem:[%s2090_s25 + $0x38] sm:$0xff]   ;;  %v748_v27 = vld [vmem:[%s2106_s29] sm:$0x1]  ;;  %v749_v31 = vld [vmem:[%s2106_s29 + $0x1] sm:$0x1] }
 0x1fa   : > { %1311 = vmatpush3.bf16.msra.mxu0 %v1488_v50  ;;  %v643_v57 = vld [vmem:[#allocation3] sm:$0xf] }
 0x1fb   : > { %1312 = vmatprep.subr.bf16.mxu0 %v1765_v49 }
 0x1fc   : > { %1331 = vmatpush3.bf16.msra.mxu1 %v1496_v59 }
 0x1fd   : > { %1332 = vmatprep.subr.bf16.mxu1 %v1765_v49 }
 0x1fe   : > { %1313 = vmatpush3.bf16.msra.mxu0 %v1489_v51 }
 0x1ff   : > { %1314 = vmatprep.subr.bf16.mxu0 %v1765_v49 }
 0x200   : > { %1333 = vmatpush3.bf16.msra.mxu1 %v1497_v60 }
 0x201   : > { %1334 = vmatprep.subr.bf16.mxu1 %v1765_v49 }
 0x202   : > { %1315 = vmatpush3.bf16.msra.mxu0 %v1490_v52 }
 0x203   : > { %1316 = vmatprep.subr.bf16.mxu0 %v1765_v49 }
 0x204   : > { %1335 = vmatpush3.bf16.msra.mxu1 %v1498_v61 }
 0x205   : > { %1336 = vmatprep.subr.bf16.mxu1 %v1765_v49 }
 0x206   : > { %1317 = vmatpush3.bf16.msra.mxu0 %v1491_v53 }
 0x207   : > { %1318 = vmatprep.subr.bf16.mxu0 %v1765_v49 }
 0x208   : > { %1337 = vmatpush3.bf16.msra.mxu1 %v1499_v62 }
 0x209   : > { %1338 = vmatprep.subr.bf16.mxu1 %v1765_v49 }
 0x20a   : > { %1319 = vmatpush3.bf16.msra.mxu0 %v1492_v54 }
 0x20b   : > { %1320 = vmatprep.subr.bf16.mxu0 %v1765_v49 }
 0x20c   : > { %1339 = vmatpush3.bf16.msra.mxu1 %v1500_v63  ;;  %v893_v63 = vld [vmem:[%s2111_s22] sm:$0x1] }
 0x20d   : > { %1340 = vmatprep.subr.bf16.mxu1 %v1765_v49 }
 0x20e   : > { %1321 = vmatpush3.bf16.msra.mxu0 %v1493_v55 }
 0x20f   : > { %1322 = vmatprep.subr.bf16.mxu0 %v1765_v49 }
 0x210   : > { %1341 = vmatpush3.bf16.msra.mxu1 %v1501_v0 }
 0x211   : > { %1342 = vmatprep.subr.bf16.mxu1 %v1765_v49 }
 0x212   : > { %1323 = vmatpush3.bf16.msra.mxu0 %v1494_v56 }
 0x214   : > { %1343 = vmatpush3.bf16.msra.mxu1 %v1502_v1 }
 0x215   : > { %1325 = vmatmul.mubr.bf16.vlgmr.msra.gmra.mrb[0].mxu0 %v643_v57 }
 0x2e8   : > { %v742_v2 = vpop.f32.mrb[0].mxu0 }
 0x2e9   : > { %v750_v3 = vrot.slane %v742_v2, 4  ;;  %v757_v4 = vmul.f32 %v742_v2, %v742_v2  ;;  %v1326_v5 = vpop.f32.mrb[1].mxu0 }
 0x2ea   : > { %v745_v6 = vpop.f32.mrb[2].mxu0 }
 0x2eb   : > { %v751_v7 = vadd.f32 %v750_v3, %v742_v2  ;;  %v758_v8 = vrot.slane %v757_v4, 4  ;;  %v1327_v9 = vpop.f32.mrb[3].mxu0 }
 0x2ed   : > { %v752_v10 = vrot.slane %v751_v7, 2  ;;  %v759_v11 = vadd.f32 %v758_v8, %v757_v4  ;;  %v892_v8 = vld [vmem:[#allocation2] sm:$0xff] }
 0x2ef   : > { %v753_v12 = vadd.f32 %v752_v10, %v751_v7  ;;  %v760_v13 = vrot.slane %v759_v11, 2 }
 0x2f1   : > { %v754_v14 = vrot.slane %v753_v12, 1  ;;  %v761_v15 = vadd.f32 %v760_v13, %v759_v11  ;;  %v1507_v13 = vld [vmem:[#allocation10] sm:$0xff] (%p933_p2)  }
 0x2f3   : > { %v755_v16 = vadd.f32 %v754_v14, %v753_v12  ;;  %v762_v17 = vrot.slane %v761_v15, 1  ;;  %v1767_v14 = vmov (%p933_p2), 0.0  }
 0x2f4   : > { %1348 = vmatprep.subr.bf16.mxu0 (%p933_p2), %v1767_v14  ;;  %1364 = vmatprep.mubr.msk.bf16.mxu0 (%p933_p2), %vm1768_vm2, %v1767_v14 }
 0x2f5   : > { %v756_v18 = vmul.f32 0.125, %v755_v16  ;;  %v763_v19 = vadd.f32 %v762_v17, %v761_v15  ;;  %1349 = vmatpush3.bf16.msra.mxu0 (%p933_p2), %v1507_v13  ;;  %v1508_v15 = vld [vmem:[#allocation10 + $0x8] sm:$0xff] (%p933_p2)   ;;  %v1509_v16 = vld [vmem:[#allocation10 + $0x10] sm:$0xff] (%p933_p2)   ;;  %v1510_v17 = vld [vmem:[#allocation10 + $0x18] sm:$0xff] (%p933_p2)  }
 0x2f6   : > { %1350 = vmatprep.subr.bf16.mxu0 (%p933_p2), %v1767_v14 }
 0x2f7   : > { %v764_v20 = vmul.f32 0.125, %v763_v19  ;;  %v765_v21 = vmul.f32 %v756_v18, %v756_v18  ;;  %v1512_v19 = vld [vmem:[#allocation10 + $0x28] sm:$0xff] (%p933_p2)  }
 0x2f9   : > { %v766_v22 = vsub.f32 %v764_v20, %v765_v21  ;;  %1351 = vmatpush3.bf16.msra.mxu0 (%p933_p2), %v1508_v15  ;;  %v1513_v20 = vld [vmem:[#allocation10 + $0x30] sm:$0xff] (%p933_p2)   ;;  %v1514_v21 = vld [vmem:[#allocation10 + $0x38] sm:$0xff] (%p933_p2)  }
 0x2fa   : > { %1352 = vmatprep.subr.bf16.mxu0 (%p933_p2), %v1767_v14 }
 0x2fb   : > { %v767_v23 = vmax.f32 %v766_v22, 0.0 }
 0x2fd   : > { %v768_v24 = vadd.f32 1e-05, %v767_v23  ;;  %1353 = vmatpush3.bf16.msra.mxu0 (%p933_p2), %v1509_v16  ;;  %v1237_v23 = vld [vmem:[#allocation11] ss:$0 sm:$0xff] (%p933_p2) }
 0x2fe   : > { %1354 = vmatprep.subr.bf16.mxu0 (%p933_p2), %v1767_v14 }
 0x2ff   : > { %1503 = vrsqrt.f32 %v768_v24 }
 0x301   : > { %1355 = vmatpush3.bf16.msra.mxu0 (%p933_p2), %v1510_v17 }
 0x302   : > { %1356 = vmatprep.subr.bf16.mxu0 (%p933_p2), %v1767_v14 }
 0x309   : > { %v1504_v29 = vpop.eup %1503 }
 0x30a   : > { %v770_v30 = vmul.f32 %v1504_v29, %v748_v27 }
 0x30c   : > { %v774_v32 = vrot.slane %v770_v30, %v773_v28  ;;  %v776_v33 = vmul.f32 %v770_v30, %v756_v18  ;;  %v1511_v18 = vld [vmem:[#allocation10 + $0x20] sm:$0xff] (%p933_p2)  }
 0x30d   : > { %1357 = vmatpush3.bf16.msra.mxu0 (%p933_p2), %v1511_v18 }
 0x30e   : > { %v777_v34 = vsub.f32 %v749_v31, %v776_v33  ;;  %v775_v35 = vmul.f32 %v774_v32, %v742_v2  ;;  %v894_v2 = vld [vmem:[%s2111_s22 + $0x1] sm:$0x1]  ;;  %1358 = vmatprep.subr.bf16.mxu0 (%p933_p2), %v1767_v14 }
 0x310   : > { %v781_v36 = vrot.slane %v777_v34, %v773_v28 }
 0x311   : > { %1359 = vmatpush3.bf16.msra.mxu0 (%p933_p2), %v1512_v19 }
 0x312   : > { %v782_v37 = vadd.f32 %v781_v36, %v775_v35  ;;  %1360 = vmatprep.subr.bf16.mxu0 (%p933_p2), %v1767_v14 }
 0x314   : > { %v783_v38 = vmax.f32 %v782_v37, 0.0 }
 0x315   : > { %1361 = vmatpush3.bf16.msra.mxu0 (%p933_p2), %v1513_v20 }
 0x316   : > { %v784_v39 = vpack.c.bf16 %v783_v38, %v783_v38  ;;  %1362 = vmatprep.subr.bf16.mxu0 (%p933_p2), %v1767_v14 }
 0x318   : > { %1345 = vmatmul.mubr.bf16.vlgmr.msra.gmra.mrb[0].mxu1 %v784_v39 }
 0x319   : > { %1363 = vmatpush3.bf16.msra.mxu0 (%p933_p2), %v1514_v21 }
 0x3eb   : > { %v883_v40 = vpop.f32.mrb[0].mxu1 }
 0x3ec   : > { %v895_v41 = vrot.slane %v883_v40, 4  ;;  %v902_v42 = vmul.f32 %v883_v40, %v883_v40  ;;  %v1346_v43 = vpop.f32.mrb[1].mxu1 }
 0x3ed   : > { %v886_v44 = vpop.f32.mrb[2].mxu1 }
 0x3ee   : > { %v896_v45 = vadd.f32 %v895_v41, %v883_v40  ;;  %v903_v46 = vrot.slane %v902_v42, 4  ;;  %v1347_v47 = vpop.f32.mrb[3].mxu1 }
 0x3f0   : > { %v897_v48 = vrot.slane %v896_v45, 2  ;;  %v904_v49 = vadd.f32 %v903_v46, %v902_v42 }
 0x3f2   : > { %v898_v50 = vadd.f32 %v897_v48, %v896_v45  ;;  %v905_v51 = vrot.slane %v904_v49, 2 }
 0x3f4   : > { %v899_v52 = vrot.slane %v898_v50, 1  ;;  %v906_v53 = vadd.f32 %v905_v51, %v904_v49 }
 0x3f6   : > { %v900_v54 = vadd.f32 %v899_v52, %v898_v50  ;;  %v907_v55 = vrot.slane %v906_v53, 1 }
 0x3f8   : > { %v901_v56 = vmul.f32 0.125, %v900_v54  ;;  %v908_v57 = vadd.f32 %v907_v55, %v906_v53 }
 0x3fa   : > { %v909_v58 = vmul.f32 0.125, %v908_v57  ;;  %v910_v59 = vmul.f32 %v901_v56, %v901_v56 }
 0x3fc   : > { %v911_v60 = vsub.f32 %v909_v58, %v910_v59 }
 0x3fe   : > { %v912_v61 = vmax.f32 %v911_v60, 0.0 }
 0x400   : > { %v913_v62 = vadd.f32 1e-05, %v912_v61 }
 0x402   : > { %1505 = vrsqrt.f32 %v913_v62 }
 0x40c   : > { %v1506_v0 = vpop.eup %1505 }
 0x40d   : > { %v915_v1 = vmul.f32 %v1506_v0, %v893_v63 }
 0x40f   : > { %v919_v3 = vrot.slane %v915_v1, %v773_v28  ;;  %v921_v4 = vmul.f32 %v915_v1, %v901_v56 }
 0x411   : > { %v922_v5 = vsub.f32 %v894_v2, %v921_v4  ;;  %v920_v6 = vmul.f32 %v919_v3, %v883_v40 }
 0x413   : > { %v926_v7 = vrot.slane %v922_v5, %v773_v28 }
 0x415   : > { %v927_v9 = vadd.f32 %v926_v7, %v920_v6 }
 0x417   : > { %v928_v10 = vadd.f32 %v927_v9, %v892_v8  ;;  %937 = sbr.rel (!%p933_p2) target bundleno = 1276 (0x4fc), region = 92 }
 0x419   : > { %v929_v11 = vmax.f32 %v928_v10, 0.0 }
 0x41b   : > { %930 = vst [vmem:[#allocation2] sm:$0xff] %v929_v11  ;;  %v931_v12 = vpack.c.bf16 %v929_v11, %v929_v11 }
 0x41d   : > { %932 = vst [vmem:[#allocation3] sm:$0xf] %v931_v12 }
 0x424   : > { %v938_v22 = vld [vmem:[#allocation3] sm:$0xf] }
 0x425   : > { %1365 = vmatmul.mubr.bf16.vlgmr.msra.gmra.mrb[0].mxu0 %v938_v22 }
 0x4f8   : > { %v1044_v24 = vpop.f32.mrb[0].mxu0 }
 0x4f9   : > { %v1045_v25 = vadd.f32 %v1237_v23, %v1044_v24  ;;  %v1366_v26 = vpop.f32.mrb[1].mxu0 }
 0x4fa   : > { %v1047_v27 = vpop.f32.mrb[2].mxu0 }
 0x4fb   : > { %1050 = vst [vmem:[%s2220_s0] sm:$0xff] %v1045_v25  ;;  %v1367_v28 = vpop.f32.mrb[3].mxu0 }
 0x4fc PF: > { %s22_s14 = sadd.s32 1, %s1753_s14   ;;  %s2221_s3 = sld [smem:[#allocation18_spill]] }
 0x4fd   : > { %p19_p6 = scmp.ge.s32.totalorder %s22_s14, 10   ;;  %s2222_s11 = sld [smem:[#allocation20_spill]] }
 0x4fe   : > { %s2223_s28 = sld [smem:[#allocation19_spill]]  ;;  %s2224_s30 = smov %s1737_s10 }
 0x4ff   : > { %s2226_s12 = smov %s1749_s13  ;;  %21 = sbr.rel (!%p19_p6) target bundleno = 13 (0xd), region = 136 }
 0x502   : > { %s2225_s10 = smov %s2221_s3 }
 0x504   : > { %s2227_s13 = smov %s2223_s28 }
 0x506   :  { %1062 = vsyncpa [#allocation5], 1 }
 0x507   :  { %1064 = vsyncpa [#allocation5 + $0x1], 1 }
 0x508   :  { %1065 = vsyncpa [#allocation7], 1 }
 0x509   :  { %1066 = vsyncpa [#allocation12], 1 }

</bundles_post_ra>
